<compile_context>
chip_gen: v6e
topology: v6e:2x2x1
jax: 0.10.0
libtpu: 0.0.40
codegen_flags: <defaults>
</compile_context>

<pallas_src>
import math

import jax
import jax.numpy as jnp
from jax.experimental import pallas as pl
from jax.experimental.pallas import tpu as pltpu

LANE = 128
ROW_BLOCK = 256  # batch rows per grid step when the batch is chunked


# ----------------------------------------------------------------------------
# Fused CVAE forward kernel (kernel factory: slot indices are static)
# ----------------------------------------------------------------------------
def _make_fused_kernel(enc_mlp_idx, enc_head_idx, pri_mlp_idx, pri_head_idx,
                       dec_wz_idx, dec_wc_idx, dec_mlp_idx, dec_out_idx):
    def kernel(act_ref, w_ref, b_ref, out_ref):
        def dense(h, k):
            # (B,128) @ (128,256) + (1,256)  -- one full-width MXU pass.
            return (jnp.dot(h, w_ref[k], preferred_element_type=jnp.float32)
                    + b_ref[k])

        xc = act_ref[:, 0 * LANE:1 * LANE]    # cat(x, c), lane padded
        c = act_ref[:, 1 * LANE:2 * LANE]     # conditional variable
        eps = act_ref[:, 2 * LANE:3 * LANE]   # N(0,1) sample (padded lanes 0)

        # ---- recognition encoder on cat(x, c) --------------------------------
        h = xc
        for k in enc_mlp_idx:
            h = jnp.tanh(dense(h, k)[:, :LANE])
        stats = dense(h, enc_head_idx)            # (B, 256) = [mu | logvar]
        mu, lv = stats[:, :LANE], stats[:, LANE:]

        # ---- StochasticLayer (reparameterization) ---------------------------
        # Padded lanes: exp(0.5*0)*0 + 0 == 0, so z stays cleanly zero-padded.
        z = jnp.exp(0.5 * lv) * eps + mu

        # ---- prior network on c ----------------------------------------------
        hp = c
        for k in pri_mlp_idx:
            hp = jnp.tanh(dense(hp, k)[:, :LANE])
        pstats = dense(hp, pri_head_idx)          # (B, 256) = [pmu | plogvar]
        pmu, plv = pstats[:, :LANE], pstats[:, LANE:]

        # ---- decoder on cat(z, c): first layer split into z-half + c-half ---
        hd = dense(z, dec_wz_idx) + jnp.dot(c, w_ref[dec_wc_idx],
                                            preferred_element_type=jnp.float32)
        hd = jnp.tanh(hd[:, :LANE])
        for k in dec_mlp_idx:
            hd = jnp.tanh(dense(hd, k)[:, :LANE])
        y = jax.nn.sigmoid(dense(hd, dec_out_idx)[:, :LANE])

        # ---- single lane-dense output slab -----------------------------------
        out_ref[:, 0 * LANE:1 * LANE] = mu
        out_ref[:, 1 * LANE:2 * LANE] = lv
        out_ref[:, 2 * LANE:3 * LANE] = z
        out_ref[:, 3 * LANE:4 * LANE] = pmu
        out_ref[:, 4 * LANE:5 * LANE] = plv
        out_ref[:, 5 * LANE:6 * LANE] = y

    return kernel


# ----------------------------------------------------------------------------
# Parameter init (deterministic, mimics PyTorch nn.Linear uniform init)
# ----------------------------------------------------------------------------
def init_linear(key, in_size, out_size):
    kw, kb = jax.random.split(key)
    bound = 1.0 / math.sqrt(in_size)
    wt = jax.random.uniform(kw, (in_size, out_size), jnp.float32, -bound, bound)
    b = jax.random.uniform(kb, (out_size,), jnp.float32, -bound, bound)
    return {"wt": wt, "b": b}


def init_encoder(key, layer_sizes):
    n_mlp = len(layer_sizes) - 2
    keys = jax.random.split(key, n_mlp + 2)
    mlp = [init_linear(keys[i], layer_sizes[i], layer_sizes[i + 1]) for i in range(n_mlp)]
    fc_mu = init_linear(keys[n_mlp], layer_sizes[-2], layer_sizes[-1])
    fc_lv = init_linear(keys[n_mlp + 1], layer_sizes[-2], layer_sizes[-1])
    return {"mlp": mlp, "fc_mu": fc_mu, "fc_logvariance": fc_lv}


def init_decoder(key, layer_sizes):
    n_mlp = len(layer_sizes) - 2
    keys = jax.random.split(key, n_mlp + 1)
    mlp = [init_linear(keys[i], layer_sizes[i], layer_sizes[i + 1]) for i in range(n_mlp)]
    last = init_linear(keys[n_mlp], layer_sizes[-2], layer_sizes[-1])
    return {"mlp": mlp, "last": last}


def init_cvae(key, enc_sizes, dec_sizes, prior_network_sizes):
    k1, k2, k3 = jax.random.split(key, 3)
    return {
        "prior_network": init_encoder(k1, prior_network_sizes),
        "encoder": init_encoder(k2, enc_sizes),
        "decoder": init_decoder(k3, dec_sizes),
    }


# ----------------------------------------------------------------------------
# One-time parameter preparation: pack ALL weights into one (N, 128, 256) slab
# and all biases into one (N, 1, 256) slab; record static slot indices.
# ----------------------------------------------------------------------------
def prepare_cvae_params(params, x_dim):
    enc = params["encoder"]
    pri = params["prior_network"]
    dec = params["decoder"]
    assert len(dec["mlp"]) >= 1, "fused kernel assumes >=1 decoder MLP block"
    assert enc["mlp"][0]["wt"].shape[0] <= LANE, "x_dim + c_dim must be <= 128"

    slots_w, slots_b = [], []

    def _slot(w_lo, b_lo=None, w_hi=None, b_hi=None):
        assert w_lo.shape[0] <= LANE and w_lo.shape[1] <= LANE
        W = jnp.zeros((LANE, 2 * LANE), jnp.float32)
        Bv = jnp.zeros((1, 2 * LANE), jnp.float32)
        W = W.at[:w_lo.shape[0], :w_lo.shape[1]].set(w_lo)
        if b_lo is not None:
            Bv = Bv.at[0, :b_lo.shape[0]].set(b_lo)
        if w_hi is not None:
            assert w_hi.shape[0] <= LANE and w_hi.shape[1] <= LANE
            W = W.at[:w_hi.shape[0], LANE:LANE + w_hi.shape[1]].set(w_hi)
        if b_hi is not None:
            Bv = Bv.at[0, LANE:LANE + b_hi.shape[0]].set(b_hi)
        slots_w.append(W)
        slots_b.append(Bv)
        return len(slots_w) - 1

    # recognition encoder: input is cat(x, c) packed into lanes 0:(x_dim+c_dim)
    enc_mlp_idx = tuple(_slot(l["wt"], l["b"]) for l in enc["mlp"])
    enc_head_idx = _slot(enc["fc_mu"]["wt"], enc["fc_mu"]["b"],
                         enc["fc_logvariance"]["wt"], enc["fc_logvariance"]["b"])

    # prior network: input is c
    pri_mlp_idx = tuple(_slot(l["wt"], l["b"]) for l in pri["mlp"])
    pri_head_idx = _slot(pri["fc_mu"]["wt"], pri["fc_mu"]["b"],
                         pri["fc_logvariance"]["wt"], pri["fc_logvariance"]["b"])

    # decoder: input is cat(z, c); first layer split at the latent width
    enc_latent = enc["fc_mu"]["wt"].shape[1]
    d0 = dec["mlp"][0]
    dec_wz_idx = _slot(d0["wt"][:enc_latent], d0["b"])
    dec_wc_idx = _slot(d0["wt"][enc_latent:])             # bias lives in Wz slot
    dec_mlp_idx = tuple(_slot(l["wt"], l["b"]) for l in dec["mlp"][1:])
    dec_out_idx = _slot(dec["last"]["wt"], dec["last"]["b"])

    return {
        "w_slab": jnp.stack(slots_w),         # (N, 128, 256) f32
        "b_slab": jnp.stack(slots_b),         # (N, 1, 256) f32
        "layout": dict(enc_mlp_idx=enc_mlp_idx, enc_head_idx=enc_head_idx,
                       pri_mlp_idx=pri_mlp_idx, pri_head_idx=pri_head_idx,
                       dec_wz_idx=dec_wz_idx, dec_wc_idx=dec_wc_idx,
                       dec_mlp_idx=dec_mlp_idx, dec_out_idx=dec_out_idx),
        "enc_latent": enc_latent,
        "pri_latent": pri["fc_mu"]["wt"].shape[1],
        "out_dim": dec["last"]["wt"].shape[1],
    }


# ----------------------------------------------------------------------------
# Forward builder: one pallas_call for the whole CVAE forward pass.
# ----------------------------------------------------------------------------
def build_cvae_forward(prepared):
    lay = prepared["layout"]
    enc_latent = prepared["enc_latent"]
    pri_latent = prepared["pri_latent"]
    out_dim = prepared["out_dim"]
    n_slots = prepared["w_slab"].shape[0]

    kernel = _make_fused_kernel(lay["enc_mlp_idx"], lay["enc_head_idx"],
                                lay["pri_mlp_idx"], lay["pri_head_idx"],
                                lay["dec_wz_idx"], lay["dec_wc_idx"],
                                lay["dec_mlp_idx"], lay["dec_out_idx"])

    def forward(w_slab, b_slab, x, c, key):
        B = x.shape[0]
        x_dim, c_dim = x.shape[1], c.shape[1]
        assert x_dim + c_dim <= LANE and c_dim <= LANE and enc_latent <= LANE

        # TODO(synk): eps could be generated in-kernel via pltpu.prng_seed /
        # prng_random_bits (drops one padded input stream) at the cost of a
        # different random stream than jax.random.
        eps = jax.random.normal(key, (B, enc_latent), dtype=jnp.float32)

        # Single lane-padded activation slab: [ cat(x,c) | c | eps ]
        xc = jnp.concatenate((x, c), axis=1)
        act = jnp.concatenate([
            jnp.pad(xc, ((0, 0), (0, LANE - xc.shape[1]))),
            jnp.pad(c, ((0, 0), (0, LANE - c_dim))),
            jnp.pad(eps, ((0, 0), (0, LANE - enc_latent))),
        ], axis=1)                                              # (B, 384)

        out_shape = jax.ShapeDtypeStruct((B, 6 * LANE), jnp.float32)

        if B % ROW_BLOCK == 0 and B // ROW_BLOCK >= 2:
            # Batch-chunk grid: constant block index keeps the weight/bias
            # slabs VMEM-resident across steps; activations/outputs stream.
            # "parallel" lets v7x's two TensorCores split the chunks.
            out = pl.pallas_call(
                kernel,
                grid=(B // ROW_BLOCK,),
                in_specs=[
                    pl.BlockSpec((ROW_BLOCK, 3 * LANE), lambda i: (i, 0)),
                    pl.BlockSpec((n_slots, LANE, 2 * LANE), lambda i: (0, 0, 0)),
                    pl.BlockSpec((n_slots, 1, 2 * LANE), lambda i: (0, 0, 0)),
                ],
                out_specs=pl.BlockSpec((ROW_BLOCK, 6 * LANE), lambda i: (i, 0)),
                out_shape=out_shape,
                compiler_params=pltpu.CompilerParams(
                    dimension_semantics=("parallel",)),
            )(act, w_slab, b_slab)
        else:
            # Small batch: no grid at all -- whole arrays resident in VMEM,
            # no pipeline bookkeeping or double buffering.
            vmem = pl.BlockSpec(memory_space=pltpu.MemorySpace.VMEM)
            out = pl.pallas_call(
                kernel,
                in_specs=[vmem, vmem, vmem],
                out_specs=vmem,
                out_shape=out_shape,
            )(act, w_slab, b_slab)

        mu = out[:, 0 * LANE:0 * LANE + enc_latent]
        lv = out[:, 1 * LANE:1 * LANE + enc_latent]
        z = out[:, 2 * LANE:2 * LANE + enc_latent]
        pmu = out[:, 3 * LANE:3 * LANE + pri_latent]
        plv = out[:, 4 * LANE:4 * LANE + pri_latent]
        y = out[:, 5 * LANE:5 * LANE + out_dim]
        return (mu, lv), z, (pmu, plv), y

    return jax.jit(forward)


# ----------------------------------------------------------------------------
# Pure-JAX reference (for correctness checking)
# ----------------------------------------------------------------------------
def _ref_encoder(params, x):
    h = x
    for layer in params["mlp"]:
        h = jnp.tanh(h @ layer["wt"] + layer["b"])
    return (h @ params["fc_mu"]["wt"] + params["fc_mu"]["b"],
            h @ params["fc_logvariance"]["wt"] + params["fc_logvariance"]["b"])


def _ref_forward(params, x, c, eps):
    xc = jnp.concatenate((x, c), axis=1)
    mu, lv = _ref_encoder(params["encoder"], xc)
    z = jnp.exp(0.5 * lv) * eps + mu
    pri = _ref_encoder(params["prior_network"], c)
    h = jnp.concatenate((z, c), axis=1)
    for layer in params["decoder"]["mlp"]:
        h = jnp.tanh(h @ layer["wt"] + layer["b"])
    y = jax.nn.sigmoid(h @ params["decoder"]["last"]["wt"] + params["decoder"]["last"]["b"])
    return (mu, lv), z, pri, y


# ----------------------------------------------------------------------------
if __name__ == "__main__":
    # Small shapes implied by the module:
    #   x: (batch, x_dim) data variable, c: (batch, c_dim) conditional variable
    batch, x_dim, c_dim, hidden, latent = 8, 16, 16, 32, 8
    enc_sizes = [x_dim + c_dim, hidden, latent]        # encoder sees cat(x, c)
    dec_sizes = [latent + c_dim, hidden, x_dim]        # decoder sees cat(z, c)
    prior_network_sizes = [c_dim, hidden, latent]      # prior network sees c

    root = jax.random.PRNGKey(0)
    kp, kx, kc, keps, kx2, kc2, keps2 = jax.random.split(root, 7)

    params = init_cvae(kp, enc_sizes, dec_sizes, prior_network_sizes)
    prepared = prepare_cvae_params(params, x_dim)
    cvae_forward = build_cvae_forward(prepared)
    w_slab, b_slab = prepared["w_slab"], prepared["b_slab"]

    def run_and_check(x, c, key):
        got = cvae_forward(w_slab, b_slab, x, c, key)
        jax.block_until_ready(got)
        eps = jax.random.normal(key, (x.shape[0], latent), dtype=jnp.float32)
        ref = _ref_forward(params, x, c, eps)
        for a, b in zip(jax.tree_util.tree_leaves(got),
                        jax.tree_util.tree_leaves(ref)):
            assert a.shape == b.shape
            assert jnp.allclose(a, b, atol=1e-5, rtol=1e-5)

    # Small batch (grid-less path; everything VMEM-resident in one shot).
    x = jax.random.uniform(kx, (batch, x_dim), jnp.float32)    # Bernoulli-like data
    c = jax.random.normal(kc, (batch, c_dim), jnp.float32)
    run_and_check(x, c, keps)

    # Larger batch exercising the batch-chunk grid (weights stay VMEM-resident
    # across steps; "parallel" axis for v7x's two TensorCores).
    big = 2 * ROW_BLOCK
    xb = jax.random.uniform(kx2, (big, x_dim), jnp.float32)
    cb = jax.random.normal(kc2, (big, c_dim), jnp.float32)
    run_and_check(xb, cb, keps2)

    # TODO(synk): variational_objective / logpdf_* / conditional_likelihood /
    # prediction are loss-side / inference helpers outside forward(); left to
    # plain JAX if needed.
    print("KERNEL_OK")
</pallas_src>

<mosaic_0001>
module attributes {stable_mosaic.version = 11 : i64} {
  func.func @kernel(%arg0: memref<8x384xf32, #tpu.memory_space<vmem>>, %arg1: memref<7x128x256xf32, #tpu.memory_space<vmem>>, %arg2: memref<7x1x256xf32, #tpu.memory_space<vmem>>, %arg3: memref<8x768xf32, #tpu.memory_space<vmem>>) attributes {dimension_semantics = [], scalar_prefetch = 0 : i64, scratch_operands = 0 : i64, tpu.core_type = #tpu.core_type<tc>} {
    %c0 = arith.constant 0 : index
    %c0_0 = arith.constant 0 : index
    %0 = vector.load %arg0[%c0, %c0_0] : memref<8x384xf32, #tpu.memory_space<vmem>>, vector<8x128xf32>
    %c0_1 = arith.constant 0 : index
    %c128 = arith.constant 128 : index
    %1 = vector.load %arg0[%c0_1, %c128] : memref<8x384xf32, #tpu.memory_space<vmem>>, vector<8x128xf32>
    %c0_2 = arith.constant 0 : index
    %c256 = arith.constant 256 : index
    %2 = vector.load %arg0[%c0_2, %c256] : memref<8x384xf32, #tpu.memory_space<vmem>>, vector<8x128xf32>
    %c0_3 = arith.constant 0 : index
    %c0_4 = arith.constant 0 : index
    %c0_5 = arith.constant 0 : index
    %3 = vector.load %arg1[%c0_3, %c0_4, %c0_5] : memref<7x128x256xf32, #tpu.memory_space<vmem>>, vector<1x128x256xf32>
    %4 = vector.shape_cast %3 : vector<1x128x256xf32> to vector<128x256xf32>
    %cst = arith.constant dense<0.000000e+00> : vector<8x256xf32>
    %5 = tpu.matmul %0, %4, %cst {dimension_numbers = #tpu.dot_dimension_numbers<[1], [0], [0], [1], [0, 0, 1, 1], [], []>} : vector<8x128xf32>, vector<128x256xf32>, vector<8x256xf32> -> vector<8x256xf32>
    %c0_6 = arith.constant 0 : index
    %c0_7 = arith.constant 0 : index
    %c0_8 = arith.constant 0 : index
    %6 = vector.load %arg2[%c0_6, %c0_7, %c0_8] : memref<7x1x256xf32, #tpu.memory_space<vmem>>, vector<1x1x256xf32>
    %7 = vector.shape_cast %6 : vector<1x1x256xf32> to vector<1x256xf32>
    %8 = vector.broadcast %7 : vector<1x256xf32> to vector<8x256xf32>
    %9 = arith.addf %5, %8 : vector<8x256xf32>
    %10 = vector.extract_strided_slice %9 {offsets = [0, 0], sizes = [8, 128], strides = [1, 1]} : vector<8x256xf32> to vector<8x128xf32>
    %11 = math.tanh %10 : vector<8x128xf32>
    %c1 = arith.constant 1 : index
    %c0_9 = arith.constant 0 : index
    %c0_10 = arith.constant 0 : index
    %12 = vector.load %arg1[%c1, %c0_9, %c0_10] : memref<7x128x256xf32, #tpu.memory_space<vmem>>, vector<1x128x256xf32>
    %13 = vector.shape_cast %12 : vector<1x128x256xf32> to vector<128x256xf32>
    %cst_11 = arith.constant dense<0.000000e+00> : vector<8x256xf32>
    %14 = tpu.matmul %11, %13, %cst_11 {dimension_numbers = #tpu.dot_dimension_numbers<[1], [0], [0], [1], [0, 0, 1, 1], [], []>} : vector<8x128xf32>, vector<128x256xf32>, vector<8x256xf32> -> vector<8x256xf32>
    %c1_12 = arith.constant 1 : index
    %c0_13 = arith.constant 0 : index
    %c0_14 = arith.constant 0 : index
    %15 = vector.load %arg2[%c1_12, %c0_13, %c0_14] : memref<7x1x256xf32, #tpu.memory_space<vmem>>, vector<1x1x256xf32>
    %16 = vector.shape_cast %15 : vector<1x1x256xf32> to vector<1x256xf32>
    %17 = vector.broadcast %16 : vector<1x256xf32> to vector<8x256xf32>
    %18 = arith.addf %14, %17 : vector<8x256xf32>
    %19 = vector.extract_strided_slice %18 {offsets = [0, 0], sizes = [8, 128], strides = [1, 1]} : vector<8x256xf32> to vector<8x128xf32>
    %20 = vector.extract_strided_slice %18 {offsets = [0, 128], sizes = [8, 128], strides = [1, 1]} : vector<8x256xf32> to vector<8x128xf32>
    %cst_15 = arith.constant 5.000000e-01 : f32
    %21 = vector.broadcast %cst_15 : f32 to vector<8x128xf32>
    %22 = arith.mulf %21, %20 : vector<8x128xf32>
    %23 = math.exp %22 : vector<8x128xf32>
    %24 = arith.mulf %23, %2 : vector<8x128xf32>
    %25 = arith.addf %24, %19 : vector<8x128xf32>
    %c2 = arith.constant 2 : index
    %c0_16 = arith.constant 0 : index
    %c0_17 = arith.constant 0 : index
    %26 = vector.load %arg1[%c2, %c0_16, %c0_17] : memref<7x128x256xf32, #tpu.memory_space<vmem>>, vector<1x128x256xf32>
    %27 = vector.shape_cast %26 : vector<1x128x256xf32> to vector<128x256xf32>
    %cst_18 = arith.constant dense<0.000000e+00> : vector<8x256xf32>
    %28 = tpu.matmul %1, %27, %cst_18 {dimension_numbers = #tpu.dot_dimension_numbers<[1], [0], [0], [1], [0, 0, 1, 1], [], []>} : vector<8x128xf32>, vector<128x256xf32>, vector<8x256xf32> -> vector<8x256xf32>
    %c2_19 = arith.constant 2 : index
    %c0_20 = arith.constant 0 : index
    %c0_21 = arith.constant 0 : index
    %29 = vector.load %arg2[%c2_19, %c0_20, %c0_21] : memref<7x1x256xf32, #tpu.memory_space<vmem>>, vector<1x1x256xf32>
    %30 = vector.shape_cast %29 : vector<1x1x256xf32> to vector<1x256xf32>
    %31 = vector.broadcast %30 : vector<1x256xf32> to vector<8x256xf32>
    %32 = arith.addf %28, %31 : vector<8x256xf32>
    %33 = vector.extract_strided_slice %32 {offsets = [0, 0], sizes = [8, 128], strides = [1, 1]} : vector<8x256xf32> to vector<8x128xf32>
    %34 = math.tanh %33 : vector<8x128xf32>
    %c3 = arith.constant 3 : index
    %c0_22 = arith.constant 0 : index
    %c0_23 = arith.constant 0 : index
    %35 = vector.load %arg1[%c3, %c0_22, %c0_23] : memref<7x128x256xf32, #tpu.memory_space<vmem>>, vector<1x128x256xf32>
    %36 = vector.shape_cast %35 : vector<1x128x256xf32> to vector<128x256xf32>
    %cst_24 = arith.constant dense<0.000000e+00> : vector<8x256xf32>
    %37 = tpu.matmul %34, %36, %cst_24 {dimension_numbers = #tpu.dot_dimension_numbers<[1], [0], [0], [1], [0, 0, 1, 1], [], []>} : vector<8x128xf32>, vector<128x256xf32>, vector<8x256xf32> -> vector<8x256xf32>
    %c3_25 = arith.constant 3 : index
    %c0_26 = arith.constant 0 : index
    %c0_27 = arith.constant 0 : index
    %38 = vector.load %arg2[%c3_25, %c0_26, %c0_27] : memref<7x1x256xf32, #tpu.memory_space<vmem>>, vector<1x1x256xf32>
    %39 = vector.shape_cast %38 : vector<1x1x256xf32> to vector<1x256xf32>
    %40 = vector.broadcast %39 : vector<1x256xf32> to vector<8x256xf32>
    %41 = arith.addf %37, %40 : vector<8x256xf32>
    %42 = vector.extract_strided_slice %41 {offsets = [0, 0], sizes = [8, 128], strides = [1, 1]} : vector<8x256xf32> to vector<8x128xf32>
    %43 = vector.extract_strided_slice %41 {offsets = [0, 128], sizes = [8, 128], strides = [1, 1]} : vector<8x256xf32> to vector<8x128xf32>
    %c4 = arith.constant 4 : index
    %c0_28 = arith.constant 0 : index
    %c0_29 = arith.constant 0 : index
    %44 = vector.load %arg1[%c4, %c0_28, %c0_29] : memref<7x128x256xf32, #tpu.memory_space<vmem>>, vector<1x128x256xf32>
    %45 = vector.shape_cast %44 : vector<1x128x256xf32> to vector<128x256xf32>
    %cst_30 = arith.constant dense<0.000000e+00> : vector<8x256xf32>
    %46 = tpu.matmul %25, %45, %cst_30 {dimension_numbers = #tpu.dot_dimension_numbers<[1], [0], [0], [1], [0, 0, 1, 1], [], []>} : vector<8x128xf32>, vector<128x256xf32>, vector<8x256xf32> -> vector<8x256xf32>
    %c4_31 = arith.constant 4 : index
    %c0_32 = arith.constant 0 : index
    %c0_33 = arith.constant 0 : index
    %47 = vector.load %arg2[%c4_31, %c0_32, %c0_33] : memref<7x1x256xf32, #tpu.memory_space<vmem>>, vector<1x1x256xf32>
    %48 = vector.shape_cast %47 : vector<1x1x256xf32> to vector<1x256xf32>
    %49 = vector.broadcast %48 : vector<1x256xf32> to vector<8x256xf32>
    %50 = arith.addf %46, %49 : vector<8x256xf32>
    %c5 = arith.constant 5 : index
    %c0_34 = arith.constant 0 : index
    %c0_35 = arith.constant 0 : index
    %51 = vector.load %arg1[%c5, %c0_34, %c0_35] : memref<7x128x256xf32, #tpu.memory_space<vmem>>, vector<1x128x256xf32>
    %52 = vector.shape_cast %51 : vector<1x128x256xf32> to vector<128x256xf32>
    %cst_36 = arith.constant dense<0.000000e+00> : vector<8x256xf32>
    %53 = tpu.matmul %1, %52, %cst_36 {dimension_numbers = #tpu.dot_dimension_numbers<[1], [0], [0], [1], [0, 0, 1, 1], [], []>} : vector<8x128xf32>, vector<128x256xf32>, vector<8x256xf32> -> vector<8x256xf32>
    %54 = arith.addf %50, %53 : vector<8x256xf32>
    %55 = vector.extract_strided_slice %54 {offsets = [0, 0], sizes = [8, 128], strides = [1, 1]} : vector<8x256xf32> to vector<8x128xf32>
    %56 = math.tanh %55 : vector<8x128xf32>
    %c6 = arith.constant 6 : index
    %c0_37 = arith.constant 0 : index
    %c0_38 = arith.constant 0 : index
    %57 = vector.load %arg1[%c6, %c0_37, %c0_38] : memref<7x128x256xf32, #tpu.memory_space<vmem>>, vector<1x128x256xf32>
    %58 = vector.shape_cast %57 : vector<1x128x256xf32> to vector<128x256xf32>
    %cst_39 = arith.constant dense<0.000000e+00> : vector<8x256xf32>
    %59 = tpu.matmul %56, %58, %cst_39 {dimension_numbers = #tpu.dot_dimension_numbers<[1], [0], [0], [1], [0, 0, 1, 1], [], []>} : vector<8x128xf32>, vector<128x256xf32>, vector<8x256xf32> -> vector<8x256xf32>
    %c6_40 = arith.constant 6 : index
    %c0_41 = arith.constant 0 : index
    %c0_42 = arith.constant 0 : index
    %60 = vector.load %arg2[%c6_40, %c0_41, %c0_42] : memref<7x1x256xf32, #tpu.memory_space<vmem>>, vector<1x1x256xf32>
    %61 = vector.shape_cast %60 : vector<1x1x256xf32> to vector<1x256xf32>
    %62 = vector.broadcast %61 : vector<1x256xf32> to vector<8x256xf32>
    %63 = arith.addf %59, %62 : vector<8x256xf32>
    %64 = vector.extract_strided_slice %63 {offsets = [0, 0], sizes = [8, 128], strides = [1, 1]} : vector<8x256xf32> to vector<8x128xf32>
    %65 = arith.negf %64 : vector<8x128xf32>
    %66 = math.exp %65 : vector<8x128xf32>
    %cst_43 = arith.constant 1.000000e+00 : f32
    %67 = vector.broadcast %cst_43 : f32 to vector<8x128xf32>
    %68 = arith.addf %67, %66 : vector<8x128xf32>
    %69 = arith.divf %67, %68 : vector<8x128xf32>
    %c0_44 = arith.constant 0 : index
    %c0_45 = arith.constant 0 : index
    %70 = vector.load %arg3[%c0_44, %c0_45] : memref<8x768xf32, #tpu.memory_space<vmem>>, vector<8x128xf32>
    tpu.vector_store %arg3[%c0_44, %c0_45], %19 {strides = array<i32>} : memref<8x768xf32, #tpu.memory_space<vmem>>, vector<8x128xf32>,
    %c0_46 = arith.constant 0 : index
    %c128_47 = arith.constant 128 : index
    %71 = vector.load %arg3[%c0_46, %c128_47] : memref<8x768xf32, #tpu.memory_space<vmem>>, vector<8x128xf32>
    tpu.vector_store %arg3[%c0_46, %c128_47], %20 {strides = array<i32>} : memref<8x768xf32, #tpu.memory_space<vmem>>, vector<8x128xf32>,
    %c0_48 = arith.constant 0 : index
    %c256_49 = arith.constant 256 : index
    %72 = vector.load %arg3[%c0_48, %c256_49] : memref<8x768xf32, #tpu.memory_space<vmem>>, vector<8x128xf32>
    tpu.vector_store %arg3[%c0_48, %c256_49], %25 {strides = array<i32>} : memref<8x768xf32, #tpu.memory_space<vmem>>, vector<8x128xf32>,
    %c0_50 = arith.constant 0 : index
    %c384 = arith.constant 384 : index
    %73 = vector.load %arg3[%c0_50, %c384] : memref<8x768xf32, #tpu.memory_space<vmem>>, vector<8x128xf32>
    tpu.vector_store %arg3[%c0_50, %c384], %42 {strides = array<i32>} : memref<8x768xf32, #tpu.memory_space<vmem>>, vector<8x128xf32>,
    %c0_51 = arith.constant 0 : index
    %c512 = arith.constant 512 : index
    %74 = vector.load %arg3[%c0_51, %c512] : memref<8x768xf32, #tpu.memory_space<vmem>>, vector<8x128xf32>
    tpu.vector_store %arg3[%c0_51, %c512], %43 {strides = array<i32>} : memref<8x768xf32, #tpu.memory_space<vmem>>, vector<8x128xf32>,
    %c0_52 = arith.constant 0 : index
    %c640 = arith.constant 640 : index
    %75 = vector.load %arg3[%c0_52, %c640] : memref<8x768xf32, #tpu.memory_space<vmem>>, vector<8x128xf32>
    tpu.vector_store %arg3[%c0_52, %c640], %69 {strides = array<i32>} : memref<8x768xf32, #tpu.memory_space<vmem>>, vector<8x128xf32>,
    return
  }
}

</mosaic_0001>

<bundles_post_ra>
// kernel: forward.1
= control target key start
LH: loop header
LB: loop body
LE: loop exit
PB: predicated region body
PF: predicated region fallthrough
CT: control target
= control target key end

     0   :  { %8 = vsyncpa [#allocation3], 0  ;;  %s880_s12 = smov [#allocation2]   ;;  %s975_s0 = inlined_call_operand.vmem [shape: f32[8,384], index: 0, kind: input, shape index: {}]   ;;  %s976_s1 = inlined_call_operand.hbm [shape: f32[7,128,256], index: 1, kind: input, shape index: {}]   ;;  %s977_s2 = inlined_call_operand.vmem [shape: f32[7,1,256], index: 2, kind: input, shape index: {}]   ;;  %s978_s3 = inlined_call_operand.vmem [shape: f32[8,768], index: 3, kind: output, shape index: {}]  }
   0x1   :  { %s16_s13 = sshll.u32 %s880_s12, 4  ;;  %s17_s13 = int_to_ptr.vmem [resolvable:$true] %s16_s13 }
   0x2   :  { %s866_s14 = scalar_lea.vmem %s17_s13, 28672  ;;  %p871_p1 = scmp.lt.s32.totalorder %s17_s13, %s17_s13 }
   0x3   :  { %p867_p0 = scmp.ne.s32.totalorder %s17_s13, %s866_s14  ;;  %p872_p2 = scmp.lt.s32.totalorder %s866_s14, %s866_s14 }
   0x5   :  { %p873_p3 = por %p872_p2, %p871_p1 }
   0x7   :  { %p874_p4 = pnand %p873_p3, %p867_p0 }
   0x9   :  { %877 = shalt.err (!%p874_p4)
}
   0xa   :  { %s881_s15 = smov 256   ;;  %s882_s16 = smov 16  }
   0xb   :  { %22 = dma.hbm_to_vmem [thread:$0]  %s976_s1, 28672, %s17_s13, [#allocation3], %s881_s15, %s881_s15, %s882_s16  }
   0xc   :  { %878 = dma.done.wait [#allocation3], 28672  }
   0xd   :  { %879 = vsyncadd [#allocation3], 4294938624  ;;  %v883_v0 = vmov 0.0   ;;  %v62_v1 = vld [vmem:[#allocation2 + $0xf8] sm:$0xff]  ;;  %v61_v2 = vld [vmem:[#allocation2 + $0xf0] sm:$0xff] }
   0xe   :  { %134 = vmatprep.mubr.f32.mxu0 %v883_v0  ;;  %251 = vmatprep.mubr.f32.mxu1 %v883_v0  ;;  %v60_v3 = vld [vmem:[#allocation2 + $0xe8] sm:$0xff]  ;;  %v59_v4 = vld [vmem:[#allocation2 + $0xe0] sm:$0xff]  ;;  %v58_v5 = vld [vmem:[#allocation2 + $0xd8] sm:$0xff] }
   0xf   :  { %70 = vmatprep.subr.mxu0 %v62_v1  ;;  %v57_v6 = vld [vmem:[#allocation2 + $0xd0] sm:$0xff]  ;;  %v56_v7 = vld [vmem:[#allocation2 + $0xc8] sm:$0xff]  ;;  %v55_v8 = vld [vmem:[#allocation2 + $0xc0] sm:$0xff] }
  0x10   :  { %71 = vmatpush1.msra.mxu0 %v61_v2  ;;  %v54_v9 = vld [vmem:[#allocation2 + $0xb8] sm:$0xff]  ;;  %v53_v10 = vld [vmem:[#allocation2 + $0xb0] sm:$0xff]  ;;  %v52_v11 = vld [vmem:[#allocation2 + $0xa8] sm:$0xff] }
  0x11   :  { %72 = vmatprep.subr.mxu0 %v60_v3  ;;  %v51_v12 = vld [vmem:[#allocation2 + $0xa0] sm:$0xff]  ;;  %v50_v13 = vld [vmem:[#allocation2 + $0x98] sm:$0xff]  ;;  %v49_v14 = vld [vmem:[#allocation2 + $0x90] sm:$0xff] }
  0x12   :  { %73 = vmatpush1.msra.mxu0 %v59_v4  ;;  %v48_v15 = vld [vmem:[#allocation2 + $0x88] sm:$0xff]  ;;  %v47_v16 = vld [vmem:[#allocation2 + $0x80] sm:$0xff]  ;;  %v46_v17 = vld [vmem:[#allocation2 + $0x78] sm:$0xff] }
  0x13   :  { %74 = vmatprep.subr.mxu0 %v58_v5  ;;  %v45_v18 = vld [vmem:[#allocation2 + $0x70] sm:$0xff]  ;;  %v44_v19 = vld [vmem:[#allocation2 + $0x68] sm:$0xff]  ;;  %v43_v20 = vld [vmem:[#allocation2 + $0x60] sm:$0xff] }
  0x14   :  { %75 = vmatpush1.msra.mxu0 %v57_v6  ;;  %v42_v21 = vld [vmem:[#allocation2 + $0x58] sm:$0xff]  ;;  %v172_v23 = vld [vmem:[#allocation2 + $0x1f0] sm:$0xff]  ;;  %v171_v25 = vld [vmem:[#allocation2 + $0x1e8] sm:$0xff] }
  0x15   :  { %76 = vmatprep.subr.mxu0 %v56_v7  ;;  %v173_v22 = vld [vmem:[#allocation2 + $0x1f8] sm:$0xff]  ;;  %v41_v24 = vld [vmem:[#allocation2 + $0x50] sm:$0xff]  ;;  %v40_v26 = vld [vmem:[#allocation2 + $0x48] sm:$0xff] }
  0x16   :  { %77 = vmatpush1.msra.mxu0 %v55_v8  ;;  %187 = vmatprep.subr.mxu1 %v173_v22  ;;  %v170_v27 = vld [vmem:[#allocation2 + $0x1e0] sm:$0xff]  ;;  %v169_v28 = vld [vmem:[#allocation2 + $0x1d8] sm:$0xff]  ;;  %v168_v30 = vld [vmem:[#allocation2 + $0x1d0] sm:$0xff] }
  0x17   :  { %78 = vmatprep.subr.mxu0 %v54_v9  ;;  %188 = vmatpush1.msra.mxu1 %v172_v23  ;;  %v39_v29 = vld [vmem:[#allocation2 + $0x40] sm:$0xff]  ;;  %v38_v31 = vld [vmem:[#allocation2 + $0x38] sm:$0xff]  ;;  %v167_v32 = vld [vmem:[#allocation2 + $0x1c8] sm:$0xff] }
  0x18   :  { %79 = vmatpush1.msra.mxu0 %v53_v10  ;;  %189 = vmatprep.subr.mxu1 %v171_v25  ;;  %v37_v33 = vld [vmem:[#allocation2 + $0x30] sm:$0xff]  ;;  %v166_v34 = vld [vmem:[#allocation2 + $0x1c0] sm:$0xff]  ;;  %v36_v35 = vld [vmem:[#allocation2 + $0x28] sm:$0xff] }
  0x19   :  { %80 = vmatprep.subr.mxu0 %v52_v11  ;;  %190 = vmatpush1.msra.mxu1 %v170_v27  ;;  %v165_v36 = vld [vmem:[#allocation2 + $0x1b8] sm:$0xff]  ;;  %v35_v37 = vld [vmem:[#allocation2 + $0x20] sm:$0xff]  ;;  %v164_v38 = vld [vmem:[#allocation2 + $0x1b0] sm:$0xff] }
  0x1a   :  { %81 = vmatpush1.msra.mxu0 %v51_v12  ;;  %191 = vmatprep.subr.mxu1 %v169_v28  ;;  %v34_v39 = vld [vmem:[#allocation2 + $0x18] sm:$0xff]  ;;  %v163_v40 = vld [vmem:[#allocation2 + $0x1a8] sm:$0xff]  ;;  %v33_v41 = vld [vmem:[#allocation2 + $0x10] sm:$0xff] }
  0x1b   :  { %82 = vmatprep.subr.mxu0 %v50_v13  ;;  %192 = vmatpush1.msra.mxu1 %v168_v30  ;;  %v162_v42 = vld [vmem:[#allocation2 + $0x1a0] sm:$0xff]  ;;  %v32_v43 = vld [vmem:[#allocation2 + $0x8] sm:$0xff]  ;;  %v161_v44 = vld [vmem:[#allocation2 + $0x198] sm:$0xff] }
  0x1c   :  { %83 = vmatpush1.msra.mxu0 %v49_v14  ;;  %193 = vmatprep.subr.mxu1 %v167_v32  ;;  %v31_v45 = vld [vmem:[#allocation2] sm:$0xff]  ;;  %v160_v46 = vld [vmem:[#allocation2 + $0x190] sm:$0xff]  ;;  %v295_v48 = vld [vmem:[#allocation2 + $0x2f8] sm:$0xff] }
  0x1d   :  { %84 = vmatprep.subr.mxu0 %v48_v15  ;;  %194 = vmatpush1.msra.mxu1 %v166_v34  ;;  %v28_v47 = vld [vmem:[%s975_s0] sm:$0xff]  ;;  %v294_v49 = vld [vmem:[#allocation2 + $0x2f0] sm:$0xff]  ;;  %v293_v50 = vld [vmem:[#allocation2 + $0x2e8] sm:$0xff] }
  0x1e   :  { %85 = vmatpush1.msra.mxu0 %v47_v16  ;;  %195 = vmatprep.subr.mxu1 %v165_v36  ;;  %v159_v51 = vld [vmem:[#allocation2 + $0x188] sm:$0xff]  ;;  %v292_v52 = vld [vmem:[#allocation2 + $0x2e0] sm:$0xff]  ;;  %v291_v53 = vld [vmem:[#allocation2 + $0x2d8] sm:$0xff] }
  0x1f   :  { %86 = vmatprep.subr.mxu0 %v46_v17  ;;  %196 = vmatpush1.msra.mxu1 %v164_v38  ;;  %v290_v54 = vld [vmem:[#allocation2 + $0x2d0] sm:$0xff]  ;;  %v289_v55 = vld [vmem:[#allocation2 + $0x2c8] sm:$0xff]  ;;  %v288_v56 = vld [vmem:[#allocation2 + $0x2c0] sm:$0xff] }
  0x20   :  { %87 = vmatpush1.msra.mxu0 %v45_v18  ;;  %197 = vmatprep.subr.mxu1 %v163_v40  ;;  %v287_v57 = vld [vmem:[#allocation2 + $0x2b8] sm:$0xff]  ;;  %v286_v58 = vld [vmem:[#allocation2 + $0x2b0] sm:$0xff]  ;;  %v285_v59 = vld [vmem:[#allocation2 + $0x2a8] sm:$0xff] }
  0x21   :  { %88 = vmatprep.subr.mxu0 %v44_v19  ;;  %198 = vmatpush1.msra.mxu1 %v162_v42  ;;  %v284_v60 = vld [vmem:[#allocation2 + $0x2a0] sm:$0xff]  ;;  %v283_v61 = vld [vmem:[#allocation2 + $0x298] sm:$0xff]  ;;  %v282_v62 = vld [vmem:[#allocation2 + $0x290] sm:$0xff]  ;;  %v65_v42 = vlaneseq }
  0x22   :  { %89 = vmatpush1.msra.mxu0 %v43_v20  ;;  %199 = vmatprep.subr.mxu1 %v161_v44  ;;  %v281_v63 = vld [vmem:[#allocation2 + $0x288] sm:$0xff]  ;;  %v280_v1 = vld [vmem:[#allocation2 + $0x280] sm:$0xff]  ;;  %v279_v2 = vld [vmem:[#allocation2 + $0x278] sm:$0xff] }
  0x23   :  { %90 = vmatprep.subr.mxu0 %v42_v21  ;;  %200 = vmatpush1.msra.mxu1 %v160_v46  ;;  %v278_v3 = vld [vmem:[#allocation2 + $0x270] sm:$0xff]  ;;  %v277_v4 = vld [vmem:[#allocation2 + $0x268] sm:$0xff]  ;;  %v276_v5 = vld [vmem:[#allocation2 + $0x260] sm:$0xff] }
  0x24   :  { %91 = vmatpush1.msra.mxu0 %v41_v24  ;;  %201 = vmatprep.subr.mxu1 %v159_v51  ;;  %v275_v6 = vld [vmem:[#allocation2 + $0x258] sm:$0xff]  ;;  %v274_v7 = vld [vmem:[#allocation2 + $0x250] sm:$0xff]  ;;  %v273_v8 = vld [vmem:[#allocation2 + $0x248] sm:$0xff] }
  0x25   :  { %92 = vmatprep.subr.mxu0 %v40_v26  ;;  %v272_v9 = vld [vmem:[#allocation2 + $0x240] sm:$0xff]  ;;  %v271_v10 = vld [vmem:[#allocation2 + $0x238] sm:$0xff]  ;;  %v270_v11 = vld [vmem:[#allocation2 + $0x230] sm:$0xff] }
  0x26   :  { %93 = vmatpush1.msra.mxu0 %v39_v29  ;;  %v269_v12 = vld [vmem:[#allocation2 + $0x228] sm:$0xff]  ;;  %v268_v13 = vld [vmem:[#allocation2 + $0x220] sm:$0xff]  ;;  %v267_v14 = vld [vmem:[#allocation2 + $0x218] sm:$0xff] }
  0x27   :  { %94 = vmatprep.subr.mxu0 %v38_v31  ;;  %v266_v15 = vld [vmem:[#allocation2 + $0x210] sm:$0xff]  ;;  %v265_v16 = vld [vmem:[#allocation2 + $0x208] sm:$0xff]  ;;  %v264_v17 = vld [vmem:[#allocation2 + $0x200] sm:$0xff] }
  0x28   :  { %95 = vmatpush1.msra.mxu0 %v37_v33  ;;  %v916_v18 = vld [vmem:[%s975_s0 + $0x8] sm:$0xff]  ;;  %v158_v19 = vld [vmem:[#allocation2 + $0x180] sm:$0xff]  ;;  %v157_v20 = vld [vmem:[#allocation2 + $0x178] sm:$0xff] }
  0x29   :  { %96 = vmatprep.subr.mxu0 %v36_v35  ;;  %202 = vmatpush1.msra.mxu1 %v158_v19  ;;  %v156_v21 = vld [vmem:[#allocation2 + $0x170] sm:$0xff]  ;;  %v155_v22 = vld [vmem:[#allocation2 + $0x168] sm:$0xff]  ;;  %v154_v23 = vld [vmem:[#allocation2 + $0x160] sm:$0xff] }
  0x2a   :  { %97 = vmatpush1.msra.mxu0 %v35_v37  ;;  %203 = vmatprep.subr.mxu1 %v157_v20  ;;  %v153_v24 = vld [vmem:[#allocation2 + $0x158] sm:$0xff]  ;;  %v152_v25 = vld [vmem:[#allocation2 + $0x150] sm:$0xff]  ;;  %v151_v26 = vld [vmem:[#allocation2 + $0x148] sm:$0xff] }
  0x2b   :  { %98 = vmatprep.subr.mxu0 %v34_v39  ;;  %204 = vmatpush1.msra.mxu1 %v156_v21  ;;  %v150_v27 = vld [vmem:[#allocation2 + $0x140] sm:$0xff]  ;;  %v149_v28 = vld [vmem:[#allocation2 + $0x138] sm:$0xff]  ;;  %v148_v29 = vld [vmem:[#allocation2 + $0x130] sm:$0xff] }
  0x2c   :  { %99 = vmatpush1.msra.mxu0 %v33_v41  ;;  %205 = vmatprep.subr.mxu1 %v155_v22  ;;  %v147_v30 = vld [vmem:[#allocation2 + $0x128] sm:$0xff]  ;;  %v146_v31 = vld [vmem:[#allocation2 + $0x120] sm:$0xff]  ;;  %v145_v32 = vld [vmem:[#allocation2 + $0x118] sm:$0xff] }
  0x2d   :  { %100 = vmatprep.subr.mxu0 %v32_v43  ;;  %206 = vmatpush1.msra.mxu1 %v154_v23  ;;  %v144_v33 = vld [vmem:[#allocation2 + $0x110] sm:$0xff]  ;;  %v143_v34 = vld [vmem:[#allocation2 + $0x108] sm:$0xff]  ;;  %v142_v35 = vld [vmem:[#allocation2 + $0x100] sm:$0xff]  ;;  %v920_v43 = vshrl.u32 %v65_v42, 7 }
  0x2e   :  { %101 = vmatpush1.msra.mxu0 %v31_v45  ;;  %207 = vmatprep.subr.mxu1 %v153_v24  ;;  %v407_v36 = vld [vmem:[#allocation2 + $0x3f8] sm:$0xff]  ;;  %v523_v38 = vld [vmem:[#allocation2 + $0x4f0] sm:$0xff]  ;;  %v522_v39 = vld [vmem:[#allocation2 + $0x4e8] sm:$0xff] }
  0x2f   :  { %135 = vmatmul.mubr.f32.vlgmr.msra.gmra.mxu0 %v28_v47  ;;  %304 = vmatprep.subr.mxu0 %v295_v48  ;;  %v524_v37 = vld [vmem:[#allocation2 + $0x4f8] sm:$0xff]  ;;  %v521_v40 = vld [vmem:[#allocation2 + $0x4e0] sm:$0xff]  ;;  %v923_v44 = vsub.s32 0, %v920_v43  ;;  %v381_v19 = vld [vmem:[#allocation2 + $0x328] sm:$0xff] }
  0x30   :  { %305 = vmatpush1.msra.mxu0 %v294_v49  ;;  %368 = vmatprep.mubr.f32.mxu0 %v883_v0  ;;  %v520_v41 = vld [vmem:[#allocation2 + $0x4d8] sm:$0xff]  ;;  %v63_v45 = vld [vmem:[%s977_s2] sm:$0x3]  ;;  %v378_v22 = vld [vmem:[#allocation2 + $0x310] sm:$0xff] }
  0x31   :  { %306 = vmatprep.subr.mxu0 %v293_v50  ;;  %208 = vmatpush1.msra.mxu1 %v152_v25  ;;  %v68_v46 = vrot.slane %v63_v45, %v923_v44  ;;  %v406_v50 = vld [vmem:[#allocation2 + $0x3f0] sm:$0xff]  ;;  %v380_v20 = vld [vmem:[#allocation2 + $0x320] sm:$0xff]  ;;  %v379_v21 = vld [vmem:[#allocation2 + $0x318] sm:$0xff] }
  0x32   :  { %307 = vmatpush1.msra.mxu0 %v292_v52  ;;  %209 = vmatprep.subr.mxu1 %v151_v26  ;;  %v405_v52 = vld [vmem:[#allocation2 + $0x3e8] sm:$0xff]  ;;  %v376_v24 = vld [vmem:[#allocation2 + $0x300] sm:$0xff]  ;;  %v635_v25 = vld [vmem:[#allocation2 + $0x5f8] sm:$0xff] }
  0x33   :  { %308 = vmatprep.subr.mxu0 %v291_v53  ;;  %210 = vmatpush1.msra.mxu1 %v150_v27  ;;  %v404_v53 = vld [vmem:[#allocation2 + $0x3e0] sm:$0xff]  ;;  %v377_v23 = vld [vmem:[#allocation2 + $0x308] sm:$0xff]  ;;  %v634_v26 = vld [vmem:[#allocation2 + $0x5f0] sm:$0xff] }
  0x34   :  { %309 = vmatpush1.msra.mxu0 %v290_v54  ;;  %211 = vmatprep.subr.mxu1 %v149_v28  ;;  %v403_v54 = vld [vmem:[#allocation2 + $0x3d8] sm:$0xff]  ;;  %v633_v28 = vld [vmem:[#allocation2 + $0x5e8] sm:$0xff]  ;;  %v513_v45 = vld [vmem:[#allocation2 + $0x4a0] sm:$0xff] }
  0x35   :  { %310 = vmatprep.subr.mxu0 %v289_v55  ;;  %212 = vmatpush1.msra.mxu1 %v148_v29  ;;  %v402_v55 = vld [vmem:[#allocation2 + $0x3d0] sm:$0xff]  ;;  %v632_v29 = vld [vmem:[#allocation2 + $0x5e0] sm:$0xff]  ;;  %v625_v42 = vld [vmem:[#allocation2 + $0x5a8] sm:$0xff] }
  0x36   :  { %311 = vmatpush1.msra.mxu0 %v288_v56  ;;  %213 = vmatprep.subr.mxu1 %v147_v30  ;;  %v401_v56 = vld [vmem:[#allocation2 + $0x3c8] sm:$0xff]  ;;  %v631_v30 = vld [vmem:[#allocation2 + $0x5d8] sm:$0xff] }
  0x37   :  { %312 = vmatprep.subr.mxu0 %v287_v57  ;;  %214 = vmatpush1.msra.mxu1 %v146_v31  ;;  %v400_v57 = vld [vmem:[#allocation2 + $0x3c0] sm:$0xff]  ;;  %v519_v31 = vld [vmem:[#allocation2 + $0x4d0] sm:$0xff] }
  0x38   :  { %313 = vmatpush1.msra.mxu0 %v286_v58  ;;  %215 = vmatprep.subr.mxu1 %v145_v32  ;;  %v399_v58 = vld [vmem:[#allocation2 + $0x3b8] sm:$0xff]  ;;  %v630_v32 = vld [vmem:[#allocation2 + $0x5d0] sm:$0xff] }
  0x39   :  { %314 = vmatprep.subr.mxu0 %v285_v59  ;;  %216 = vmatpush1.msra.mxu1 %v144_v33  ;;  %v398_v59 = vld [vmem:[#allocation2 + $0x3b0] sm:$0xff]  ;;  %v518_v33 = vld [vmem:[#allocation2 + $0x4c8] sm:$0xff] }
  0x3a   :  { %315 = vmatpush1.msra.mxu0 %v284_v60  ;;  %217 = vmatprep.subr.mxu1 %v143_v34  ;;  %v397_v60 = vld [vmem:[#allocation2 + $0x3a8] sm:$0xff] }
  0x3b   :  { %316 = vmatprep.subr.mxu0 %v283_v61  ;;  %218 = vmatpush1.msra.mxu1 %v142_v35  ;;  %v396_v61 = vld [vmem:[#allocation2 + $0x3a0] sm:$0xff]  ;;  %v629_v34 = vld [vmem:[#allocation2 + $0x5c8] sm:$0xff] }
  0x3c   :  { %317 = vmatpush1.msra.mxu0 %v282_v62  ;;  %421 = vmatprep.subr.mxu1 %v407_v36  ;;  %v395_v62 = vld [vmem:[#allocation2 + $0x398] sm:$0xff]  ;;  %v517_v35 = vld [vmem:[#allocation2 + $0x4c0] sm:$0xff] }
  0x3d   :  { %318 = vmatprep.subr.mxu0 %v281_v63  ;;  %v837_v63 = vld [vmem:[%s977_s2 + $0x4] sm:$0x3] }
  0x3e   :  { %319 = vmatpush1.msra.mxu0 %v280_v1  ;;  %v394_v1 = vld [vmem:[#allocation2 + $0x390] sm:$0xff]  ;;  %v628_v36 = vld [vmem:[#allocation2 + $0x5c0] sm:$0xff] }
  0x3f   :  { %320 = vmatprep.subr.mxu0 %v279_v2  ;;  %v393_v2 = vld [vmem:[#allocation2 + $0x388] sm:$0xff] }
  0x40   :  { %321 = vmatpush1.msra.mxu0 %v278_v3  ;;  %v392_v3 = vld [vmem:[#allocation2 + $0x380] sm:$0xff] }
  0x41   :  { %322 = vmatprep.subr.mxu0 %v277_v4  ;;  %v302_v4 = vrot.slane %v837_v63, %v923_v44  ;;  %v504_v63 = vld [vmem:[#allocation2 + $0x458] sm:$0xff] }
  0x42   :  { %323 = vmatpush1.msra.mxu0 %v276_v5  ;;  %v391_v5 = vld [vmem:[#allocation2 + $0x378] sm:$0xff] }
  0x43   :  { %324 = vmatprep.subr.mxu0 %v275_v6  ;;  %v390_v6 = vld [vmem:[#allocation2 + $0x370] sm:$0xff] }
  0x44   :  { %325 = vmatpush1.msra.mxu0 %v274_v7 }
  0x45   :  { %326 = vmatprep.subr.mxu0 %v273_v8  ;;  %v389_v8 = vld [vmem:[#allocation2 + $0x368] sm:$0xff] }
  0x46   :  { %327 = vmatpush1.msra.mxu0 %v272_v9 }
  0x47   :  { %328 = vmatprep.subr.mxu0 %v271_v10  ;;  %v388_v10 = vld [vmem:[#allocation2 + $0x360] sm:$0xff] }
  0x48   :  { %329 = vmatpush1.msra.mxu0 %v270_v11 }
  0x49   :  { %330 = vmatprep.subr.mxu0 %v269_v12  ;;  %v387_v12 = vld [vmem:[#allocation2 + $0x358] sm:$0xff] }
  0x4a   :  { %331 = vmatpush1.msra.mxu0 %v268_v13  ;;  %v386_v13 = vld [vmem:[#allocation2 + $0x350] sm:$0xff] }
  0x4b   :  { %332 = vmatprep.subr.mxu0 %v267_v14  ;;  %v385_v14 = vld [vmem:[#allocation2 + $0x348] sm:$0xff] }
  0x4c   :  { %333 = vmatpush1.msra.mxu0 %v266_v15  ;;  %v384_v15 = vld [vmem:[#allocation2 + $0x340] sm:$0xff] }
  0x4d   :  { %334 = vmatprep.subr.mxu0 %v265_v16  ;;  %v383_v16 = vld [vmem:[#allocation2 + $0x338] sm:$0xff] }
  0x4e   :  { %335 = vmatpush1.msra.mxu0 %v264_v17  ;;  %v382_v17 = vld [vmem:[#allocation2 + $0x330] sm:$0xff] }
  0x4f   :  { %369 = vmatmul.mubr.f32.vlgmr.msra.gmra.mxu0 %v916_v18  ;;  %533 = vmatprep.subr.mxu0 %v524_v37  ;;  %v516_v37 = vld [vmem:[#allocation2 + $0x4b8] sm:$0xff] }
  0x50   :  { %597 = vmatprep.mubr.f32.mxu0 %v883_v0  ;;  %534 = vmatpush1.msra.mxu0 %v523_v38  ;;  %v627_v38 = vld [vmem:[#allocation2 + $0x5b8] sm:$0xff] }
  0x51   :  { %535 = vmatprep.subr.mxu0 %v522_v39  ;;  %v515_v39 = vld [vmem:[#allocation2 + $0x4b0] sm:$0xff] }
  0x52   :  { %536 = vmatpush1.msra.mxu0 %v521_v40  ;;  %v626_v40 = vld [vmem:[#allocation2 + $0x5b0] sm:$0xff] }
  0x53   :  { %537 = vmatprep.subr.mxu0 %v520_v41  ;;  %v514_v41 = vld [vmem:[#allocation2 + $0x4a8] sm:$0xff] }
  0x54   :  { %538 = vmatpush1.msra.mxu0 %v519_v31 }
  0x55   :  { %539 = vmatprep.subr.mxu0 %v518_v33 }
  0x56   :  { %540 = vmatpush1.msra.mxu0 %v517_v35 }
  0x57   :  { %541 = vmatprep.subr.mxu0 %v516_v37 }
  0x58   :  { %542 = vmatpush1.msra.mxu0 %v515_v39  ;;  %v838_v39 = vld [vmem:[%s977_s2 + $0x6] sm:$0x3] }
  0x59   :  { %543 = vmatprep.subr.mxu0 %v514_v41  ;;  %v737_v41 = vld [vmem:[#allocation2 + $0x6e0] sm:$0xff] }
  0x5a   :  { %544 = vmatpush1.msra.mxu0 %v513_v45  ;;  %v414_v45 = vrot.slane %v838_v39, %v923_v44 }
  0xef   :  { %v136_v47 = vpop.f32.mrf.mxu0 }
  0xf0   :  { %v137_v48 = vadd.f32 %v136_v47, %v68_v46  ;;  %v624_v46 = vld [vmem:[#allocation2 + $0x5a0] sm:$0xff]  ;;  %v512_v47 = vld [vmem:[#allocation2 + $0x498] sm:$0xff] }
  0xf1   :  { %v138_v49 = vpop.f32.mrf.mxu0  ;;  %545 = vmatprep.subr.mxu0 %v512_v47  ;;  %v734_v47 = vld [vmem:[#allocation2 + $0x6c8] sm:$0xff] }
  0xf2   :  { %846 = vtanh.f32 %v137_v48  ;;  %v623_v48 = vld [vmem:[#allocation2 + $0x598] sm:$0xff]  ;;  %v511_v49 = vld [vmem:[#allocation2 + $0x490] sm:$0xff] }
  0xf3   :  { %546 = vmatpush1.msra.mxu0 %v511_v49  ;;  %v733_v49 = vld [vmem:[#allocation2 + $0x6c0] sm:$0xff] }
  0xff   :  { %v847_v51 = vpop.eup %846 }
 0x100   :  { %252 = vmatmul.mubr.f32.vlgmr.msra.gmra.mxu1 %v847_v51  ;;  %v510_v51 = vld [vmem:[#allocation2 + $0x488] sm:$0xff] }
 0x101   :  { %422 = vmatpush1.msra.mxu1 %v406_v50  ;;  %485 = vmatprep.mubr.f32.mxu1 %v883_v0  ;;  %v622_v50 = vld [vmem:[#allocation2 + $0x590] sm:$0xff] }
 0x102   :  { %423 = vmatprep.subr.mxu1 %v405_v52  ;;  %v621_v52 = vld [vmem:[#allocation2 + $0x588] sm:$0xff]  ;;  %547 = vmatprep.subr.mxu0 %v510_v51  ;;  %v732_v51 = vld [vmem:[#allocation2 + $0x6b8] sm:$0xff] }
 0x103   :  { %424 = vmatpush1.msra.mxu1 %v404_v53  ;;  %v509_v53 = vld [vmem:[#allocation2 + $0x480] sm:$0xff] }
 0x104   :  { %425 = vmatprep.subr.mxu1 %v403_v54  ;;  %v620_v54 = vld [vmem:[#allocation2 + $0x580] sm:$0xff]  ;;  %548 = vmatpush1.msra.mxu0 %v509_v53  ;;  %v731_v53 = vld [vmem:[#allocation2 + $0x6b0] sm:$0xff] }
 0x105   :  { %426 = vmatpush1.msra.mxu1 %v402_v55  ;;  %v508_v55 = vld [vmem:[#allocation2 + $0x478] sm:$0xff] }
 0x106   :  { %427 = vmatprep.subr.mxu1 %v401_v56  ;;  %v619_v56 = vld [vmem:[#allocation2 + $0x578] sm:$0xff]  ;;  %549 = vmatprep.subr.mxu0 %v508_v55  ;;  %v730_v55 = vld [vmem:[#allocation2 + $0x6a8] sm:$0xff] }
 0x107   :  { %428 = vmatpush1.msra.mxu1 %v400_v57  ;;  %v507_v57 = vld [vmem:[#allocation2 + $0x470] sm:$0xff] }
 0x108   :  { %429 = vmatprep.subr.mxu1 %v399_v58  ;;  %v618_v58 = vld [vmem:[#allocation2 + $0x570] sm:$0xff]  ;;  %550 = vmatpush1.msra.mxu0 %v507_v57  ;;  %v728_v57 = vld [vmem:[#allocation2 + $0x698] sm:$0xff] }
 0x109   :  { %430 = vmatpush1.msra.mxu1 %v398_v59  ;;  %v506_v59 = vld [vmem:[#allocation2 + $0x468] sm:$0xff] }
 0x10a   :  { %431 = vmatprep.subr.mxu1 %v397_v60  ;;  %v617_v60 = vld [vmem:[#allocation2 + $0x568] sm:$0xff]  ;;  %551 = vmatprep.subr.mxu0 %v506_v59 }
 0x10b   :  { %432 = vmatpush1.msra.mxu1 %v396_v61  ;;  %v505_v61 = vld [vmem:[#allocation2 + $0x460] sm:$0xff] }
 0x10c   :  { %433 = vmatprep.subr.mxu1 %v395_v62  ;;  %v616_v62 = vld [vmem:[#allocation2 + $0x560] sm:$0xff]  ;;  %552 = vmatpush1.msra.mxu0 %v505_v61 }
 0x10d   :  { %434 = vmatpush1.msra.mxu1 %v394_v1  ;;  %v615_v1 = vld [vmem:[#allocation2 + $0x558] sm:$0xff]  ;;  %553 = vmatprep.subr.mxu0 %v504_v63  ;;  %v725_v61 = vld [vmem:[#allocation2 + $0x680] sm:$0xff] }
 0x10e   :  { %435 = vmatprep.subr.mxu1 %v393_v2  ;;  %v503_v2 = vld [vmem:[#allocation2 + $0x450] sm:$0xff]  ;;  %v724_v63 = vld [vmem:[#allocation2 + $0x678] sm:$0xff] }
 0x10f   :  { %436 = vmatpush1.msra.mxu1 %v392_v3  ;;  %v370_v7 = vpop.f32.mrf.mxu0  ;;  %v614_v3 = vld [vmem:[#allocation2 + $0x550] sm:$0xff]  ;;  %554 = vmatpush1.msra.mxu0 %v503_v2  ;;  %v722_v2 = vld [vmem:[#allocation2 + $0x668] sm:$0xff] }
 0x110   :  { %v371_v9 = vadd.f32 %v370_v7, %v302_v4  ;;  %437 = vmatprep.subr.mxu1 %v391_v5  ;;  %v502_v4 = vld [vmem:[#allocation2 + $0x448] sm:$0xff]  ;;  %v612_v7 = vld [vmem:[#allocation2 + $0x540] sm:$0xff] }
 0x111   :  { %438 = vmatpush1.msra.mxu1 %v390_v6  ;;  %v372_v11 = vpop.f32.mrf.mxu0  ;;  %v613_v5 = vld [vmem:[#allocation2 + $0x548] sm:$0xff]  ;;  %v501_v6 = vld [vmem:[#allocation2 + $0x440] sm:$0xff]  ;;  %555 = vmatprep.subr.mxu0 %v502_v4  ;;  %v720_v4 = vld [vmem:[#allocation2 + $0x658] sm:$0xff] }
 0x112   :  { %848 = vtanh.f32 %v371_v9  ;;  %439 = vmatprep.subr.mxu1 %v389_v8  ;;  %v500_v8 = vld [vmem:[#allocation2 + $0x438] sm:$0xff]  ;;  %v610_v11 = vld [vmem:[#allocation2 + $0x530] sm:$0xff]  ;;  %556 = vmatpush1.msra.mxu0 %v501_v6  ;;  %v718_v6 = vld [vmem:[#allocation2 + $0x648] sm:$0xff] }
 0x113   :  { %440 = vmatpush1.msra.mxu1 %v388_v10  ;;  %v611_v9 = vld [vmem:[#allocation2 + $0x538] sm:$0xff]  ;;  %v499_v10 = vld [vmem:[#allocation2 + $0x430] sm:$0xff]  ;;  %557 = vmatprep.subr.mxu0 %v500_v8 }
 0x114   :  { %441 = vmatprep.subr.mxu1 %v387_v12  ;;  %v498_v12 = vld [vmem:[#allocation2 + $0x428] sm:$0xff]  ;;  %558 = vmatpush1.msra.mxu0 %v499_v10  ;;  %v716_v8 = vld [vmem:[#allocation2 + $0x638] sm:$0xff] }
 0x115   :  { %442 = vmatpush1.msra.mxu1 %v386_v13  ;;  %v609_v13 = vld [vmem:[#allocation2 + $0x528] sm:$0xff]  ;;  %559 = vmatprep.subr.mxu0 %v498_v12  ;;  %v712_v12 = vld [vmem:[#allocation2 + $0x618] sm:$0xff] }
 0x116   :  { %443 = vmatprep.subr.mxu1 %v385_v14  ;;  %v497_v14 = vld [vmem:[#allocation2 + $0x420] sm:$0xff]  ;;  %v714_v10 = vld [vmem:[#allocation2 + $0x628] sm:$0xff] }
 0x117   :  { %444 = vmatpush1.msra.mxu1 %v384_v15  ;;  %v608_v15 = vld [vmem:[#allocation2 + $0x520] sm:$0xff]  ;;  %560 = vmatpush1.msra.mxu0 %v497_v14  ;;  %v710_v14 = vld [vmem:[#allocation2 + $0x608] sm:$0xff] }
 0x118   :  { %445 = vmatprep.subr.mxu1 %v383_v16  ;;  %v496_v16 = vld [vmem:[#allocation2 + $0x418] sm:$0xff] }
 0x119   :  { %446 = vmatpush1.msra.mxu1 %v382_v17  ;;  %v607_v17 = vld [vmem:[#allocation2 + $0x518] sm:$0xff]  ;;  %561 = vmatprep.subr.mxu0 %v496_v16  ;;  %v839_v16 = vld [vmem:[%s977_s2 + $0x8] sm:$0x3] }
 0x11a   :  { %447 = vmatprep.subr.mxu1 %v381_v19  ;;  %v495_v19 = vld [vmem:[#allocation2 + $0x410] sm:$0xff] }
 0x11b   :  { %448 = vmatpush1.msra.mxu1 %v380_v20  ;;  %v606_v20 = vld [vmem:[#allocation2 + $0x510] sm:$0xff]  ;;  %562 = vmatpush1.msra.mxu0 %v495_v19 }
 0x11c   :  { %449 = vmatprep.subr.mxu1 %v379_v21  ;;  %v494_v21 = vld [vmem:[#allocation2 + $0x408] sm:$0xff] }
 0x11d   :  { %450 = vmatpush1.msra.mxu1 %v378_v22  ;;  %v605_v22 = vld [vmem:[#allocation2 + $0x508] sm:$0xff]  ;;  %563 = vmatprep.subr.mxu0 %v494_v21 }
 0x11e   :  { %451 = vmatprep.subr.mxu1 %v377_v23  ;;  %v493_v23 = vld [vmem:[#allocation2 + $0x400] sm:$0xff] }
 0x11f   :  { %v849_v27 = vpop.eup %848  ;;  %452 = vmatpush1.msra.mxu1 %v376_v24  ;;  %v604_v24 = vld [vmem:[#allocation2 + $0x500] sm:$0xff]  ;;  %564 = vmatpush1.msra.mxu0 %v493_v23 }
 0x120   :  { %636 = vmatprep.subr.mxu1 %v635_v25  ;;  %486 = vmatmul.mubr.f32.vlgmr.msra.gmra.mxu1 %v849_v27  ;;  %v740_v25 = vld [vmem:[#allocation2 + $0x6f8] sm:$0xff]  ;;  %v183_v27 = vsub.s32 1, %v920_v43  ;;  %v30_v43 = vld [vmem:[%s975_s0 + $0x10] sm:$0xff] }
 0x121   :  { %637 = vmatpush1.msra.mxu1 %v634_v26  ;;  %700 = vmatprep.mubr.f32.mxu1 %v883_v0  ;;  %v836_v26 = vld [vmem:[%s977_s2 + $0x2] sm:$0x3] }
 0x122   :  { %638 = vmatprep.subr.mxu1 %v633_v28  ;;  %749 = vmatprep.subr.mxu0 %v740_v25  ;;  %v180_v28 = vrot.slane %v836_v26, %v923_v44 }
 0x123   :  { %639 = vmatpush1.msra.mxu1 %v632_v29  ;;  %v184_v29 = vrot.slane %v836_v26, %v183_v27 }
 0x124   :  { %640 = vmatprep.subr.mxu1 %v631_v30 }
 0x125   :  { %641 = vmatpush1.msra.mxu1 %v630_v32 }
 0x126   :  { %642 = vmatprep.subr.mxu1 %v629_v34 }
 0x127   :  { %643 = vmatpush1.msra.mxu1 %v628_v36 }
 0x128   :  { %644 = vmatprep.subr.mxu1 %v627_v38  ;;  %v739_v38 = vld [vmem:[#allocation2 + $0x6f0] sm:$0xff] }
 0x129   :  { %645 = vmatpush1.msra.mxu1 %v626_v40  ;;  %v738_v40 = vld [vmem:[#allocation2 + $0x6e8] sm:$0xff] }
 0x12a   :  { %646 = vmatprep.subr.mxu1 %v625_v42  ;;  %v736_v42 = vld [vmem:[#allocation2 + $0x6d8] sm:$0xff] }
 0x12b   :  { %647 = vmatpush1.msra.mxu1 %v624_v46  ;;  %v735_v46 = vld [vmem:[#allocation2 + $0x6d0] sm:$0xff] }
 0x12c   :  { %648 = vmatprep.subr.mxu1 %v623_v48  ;;  %v418_v48 = vrot.slane %v838_v39, %v183_v27 }
 0x12d   :  { %649 = vmatpush1.msra.mxu1 %v622_v50 }
 0x12e   :  { %650 = vmatprep.subr.mxu1 %v621_v52 }
 0x12f   :  { %651 = vmatpush1.msra.mxu1 %v620_v54 }
 0x130   :  { %652 = vmatprep.subr.mxu1 %v619_v56  ;;  %v729_v56 = vld [vmem:[#allocation2 + $0x6a0] sm:$0xff] }
 0x131   :  { %653 = vmatpush1.msra.mxu1 %v618_v58  ;;  %v727_v58 = vld [vmem:[#allocation2 + $0x690] sm:$0xff] }
 0x132   :  { %654 = vmatprep.subr.mxu1 %v617_v60  ;;  %v726_v60 = vld [vmem:[#allocation2 + $0x688] sm:$0xff] }
 0x133   :  { %655 = vmatpush1.msra.mxu1 %v616_v62 }
 0x134   :  { %656 = vmatprep.subr.mxu1 %v615_v1  ;;  %v723_v1 = vld [vmem:[#allocation2 + $0x670] sm:$0xff] }
 0x135   :  { %657 = vmatpush1.msra.mxu1 %v614_v3  ;;  %v721_v3 = vld [vmem:[#allocation2 + $0x660] sm:$0xff] }
 0x136   :  { %658 = vmatprep.subr.mxu1 %v613_v5  ;;  %v719_v5 = vld [vmem:[#allocation2 + $0x650] sm:$0xff] }
 0x137   :  { %659 = vmatpush1.msra.mxu1 %v612_v7  ;;  %v717_v7 = vld [vmem:[#allocation2 + $0x640] sm:$0xff] }
 0x138   :  { %660 = vmatprep.subr.mxu1 %v611_v9  ;;  %v715_v9 = vld [vmem:[#allocation2 + $0x630] sm:$0xff] }
 0x139   :  { %661 = vmatpush1.msra.mxu1 %v610_v11  ;;  %v713_v11 = vld [vmem:[#allocation2 + $0x620] sm:$0xff] }
 0x13a   :  { %662 = vmatprep.subr.mxu1 %v609_v13  ;;  %v711_v13 = vld [vmem:[#allocation2 + $0x610] sm:$0xff] }
 0x13b   :  { %663 = vmatpush1.msra.mxu1 %v608_v15  ;;  %v709_v15 = vld [vmem:[#allocation2 + $0x600] sm:$0xff] }
 0x13c   :  { %664 = vmatprep.subr.mxu1 %v607_v17  ;;  %v531_v17 = vrot.slane %v839_v16, %v923_v44 }
 0x13d   :  { %665 = vmatpush1.msra.mxu1 %v606_v20 }
 0x13e   :  { %666 = vmatprep.subr.mxu1 %v605_v22 }
 0x13f   :  { %667 = vmatpush1.msra.mxu1 %v604_v24  ;;  %v840_v24 = vld [vmem:[%s977_s2 + $0xc] sm:$0x3] }
 0x140   :  { %701 = vmatmul.mubr.f32.vlgmr.msra.gmra.mxu1 %v916_v18  ;;  %v747_v25 = vrot.slane %v840_v24, %v923_v44 }
 0x1c0   :  { %v253_v30 = vpop.f32.mrf.mxu1 }
 0x1c1   :  { %v254_v31 = vadd.f32 %v253_v30, %v180_v28 }
 0x1c2   :  { %v255_v32 = vpop.f32.mrf.mxu1 }
 0x1c3   :  { %825 = vst [vmem:[%s978_s3] sm:$0xff] %v254_v31  ;;  %v256_v33 = vadd.f32 %v255_v32, %v184_v29 }
 0x1c5   :  { %v258_v18 = vmul.f32 0.5, %v256_v33  ;;  %826 = vst [vmem:[%s978_s3 + $0x8] sm:$0xff] %v256_v33 }
 0x1c7   :  { %v259_v34 = vmul.f32 1.442695, %v258_v18 }
 0x1c9   :  { %850 = vpow2.f32 %v259_v34 }
 0x1d6   :  { %v851_v35 = vpop.eup %850 }
 0x1d7   :  { %v261_v36 = vmul.f32 %v851_v35, %v30_v43 }
 0x1d9   :  { %v262_v37 = vadd.f32 %v261_v36, %v254_v31 }
 0x1db   :  { %598 = vmatmul.mubr.f32.vlgmr.msra.gmra.mxu0 %v262_v37  ;;  %827 = vst [vmem:[%s978_s3 + $0x10] sm:$0xff] %v262_v37 }
 0x1dc   :  { %750 = vmatpush1.msra.mxu0 %v739_v38  ;;  %813 = vmatprep.mubr.f32.mxu0 %v883_v0 }
 0x1dd   :  { %751 = vmatprep.subr.mxu0 %v738_v40 }
 0x1de   :  { %752 = vmatpush1.msra.mxu0 %v737_v41 }
 0x1df   :  { %753 = vmatprep.subr.mxu0 %v736_v42 }
 0x1e0   :  { %v487_v50 = vpop.f32.mrf.mxu1  ;;  %754 = vmatpush1.msra.mxu0 %v735_v46 }
 0x1e1   :  { %v488_v52 = vadd.f32 %v487_v50, %v414_v45  ;;  %755 = vmatprep.subr.mxu0 %v734_v47 }
 0x1e2   :  { %v489_v54 = vpop.f32.mrf.mxu1  ;;  %756 = vmatpush1.msra.mxu0 %v733_v49 }
 0x1e3   :  { %828 = vst [vmem:[%s978_s3 + $0x18] sm:$0xff] %v488_v52  ;;  %v490_v0 = vadd.f32 %v489_v54, %v418_v48  ;;  %757 = vmatprep.subr.mxu0 %v732_v51 }
 0x1e4   :  { %758 = vmatpush1.msra.mxu0 %v731_v53 }
 0x1e5   :  { %829 = vst [vmem:[%s978_s3 + $0x20] sm:$0xff] %v490_v0  ;;  %759 = vmatprep.subr.mxu0 %v730_v55 }
 0x1e6   :  { %760 = vmatpush1.msra.mxu0 %v729_v56 }
 0x1e7   :  { %761 = vmatprep.subr.mxu0 %v728_v57 }
 0x1e8   :  { %762 = vmatpush1.msra.mxu0 %v727_v58 }
 0x1e9   :  { %763 = vmatprep.subr.mxu0 %v726_v60 }
 0x1ea   :  { %764 = vmatpush1.msra.mxu0 %v725_v61 }
 0x1eb   :  { %765 = vmatprep.subr.mxu0 %v724_v63 }
 0x1ec   :  { %766 = vmatpush1.msra.mxu0 %v723_v1 }
 0x1ed   :  { %767 = vmatprep.subr.mxu0 %v722_v2 }
 0x1ee   :  { %768 = vmatpush1.msra.mxu0 %v721_v3 }
 0x1ef   :  { %769 = vmatprep.subr.mxu0 %v720_v4 }
 0x1f0   :  { %770 = vmatpush1.msra.mxu0 %v719_v5 }
 0x1f1   :  { %771 = vmatprep.subr.mxu0 %v718_v6 }
 0x1f2   :  { %772 = vmatpush1.msra.mxu0 %v717_v7 }
 0x1f3   :  { %773 = vmatprep.subr.mxu0 %v716_v8 }
 0x1f4   :  { %774 = vmatpush1.msra.mxu0 %v715_v9 }
 0x1f5   :  { %775 = vmatprep.subr.mxu0 %v714_v10 }
 0x1f6   :  { %776 = vmatpush1.msra.mxu0 %v713_v11 }
 0x1f7   :  { %777 = vmatprep.subr.mxu0 %v712_v12 }
 0x1f8   :  { %778 = vmatpush1.msra.mxu0 %v711_v13 }
 0x1f9   :  { %779 = vmatprep.subr.mxu0 %v710_v14 }
 0x1fa   :  { %780 = vmatpush1.msra.mxu0 %v709_v15 }
 0x200   :  { %v702_v59 = vpop.f32.mrf.mxu1 }
 0x202   :  { %v704_v62 = vpop.f32.mrf.mxu1 }
 0x29b   :  { %v599_v19 = vpop.f32.mrf.mxu0 }
 0x29c   :  { %v600_v20 = vadd.f32 %v599_v19, %v531_v17 }
 0x29d   :  { %v601_v21 = vpop.f32.mrf.mxu0 }
 0x29e   :  { %v706_v22 = vadd.f32 %v702_v59, %v600_v20 }
 0x2a0   :  { %852 = vtanh.f32 %v706_v22 }
 0x2ad   :  { %v853_v23 = vpop.eup %852 }
 0x2ae   :  { %814 = vmatmul.mubr.f32.vlgmr.msra.gmra.mxu0 %v853_v23 }
 0x36e   :  { %v815_v26 = vpop.f32.mrf.mxu0 }
 0x36f   :  { %v816_v27 = vadd.f32 %v815_v26, %v747_v25 }
 0x370   :  { %v817_v28 = vpop.f32.mrf.mxu0 }
 0x371   :  { %v841_v29 = vmul.f32 -1.442695, %v816_v27 }
 0x373   :  { %854 = vpow2.f32 %v841_v29 }
 0x380   :  { %v855_v30 = vpop.eup %854 }
 0x381   :  { %v822_v31 = vadd.f32 1.0, %v855_v30 }
 0x383   :  { %856 = vrcp.f32 %v822_v31 }
 0x390   :  { %v857_v32 = vpop.eup %856 }
 0x391   :  { %830 = vst [vmem:[%s978_s3 + $0x28] sm:$0xff] %v857_v32 }
 0x392   :  { %835 = vsyncpa [#allocation3], 1 }

</bundles_post_ra>
